<compile_context>
chip_gen: v5e
topology: v5e:2x2
jax: 0.10.0
libtpu: 0.0.40
codegen_flags: <defaults>
</compile_context>

<pallas_src>
import jax
import jax.numpy as jnp
from jax.experimental import pallas as pl
from jax.experimental.pallas import tpu as pltpu


_LANE_CANDIDATES = (1024, 512, 256, 128)
# Sublane multiple for fully packed vregs, keyed by dtype itemsize.
_SUBLANE = {4: 8, 2: 16, 1: 32}


def _multiply_kernel(b_ref, x_ref, o_ref):
    # b_ref: SMEM scalar parameter (shape (1,)); x_ref / o_ref: VMEM tiles.
    o_ref[...] = (b_ref[0] * x_ref[...]).astype(o_ref.dtype)


def _chip_kind() -> str:
    try:
        return jax.devices()[0].device_kind.lower()
    except Exception:
        return ""


def _target_tile_bytes(kind: str) -> int:
    # 4 x tile (input + output, each double-buffered) must stay under the
    # default scoped-VMEM limit: 16 MiB on v5e, 32 MiB on v6e/v7x.
    if "v5" in kind:
        return 3 << 20            # 4x = 12 MiB resident
    if "v6" in kind or "v7" in kind:
        return 6 << 20            # 4x = 24 MiB resident
    return 3 << 20                # conservative default for unknown chips


def _choose_layout(n_elems: int, sublane: int):
    """Widest lane width whose row count is a positive multiple of the sublane."""
    for lane in _LANE_CANDIDATES:
        if n_elems % lane == 0:
            rows = n_elems // lane
            if rows >= sublane and rows % sublane == 0:
                return lane, rows
    # Fall back to any lane that divides the element count (unmasked lanes,
    # possibly partial sublanes -- only matters for small inputs).
    for lane in _LANE_CANDIDATES:
        if n_elems >= lane and n_elems % lane == 0:
            return lane, n_elems // lane
    return None, None             # caller splits off a <128-element tail


def _choose_tile_rows(rows: int, lane: int, itemsize: int, sublane: int,
                      kind: str) -> int:
    target = _target_tile_bytes(kind)
    max_rows = max(sublane,
                   (target // (lane * itemsize)) // sublane * sublane)
    if rows <= max_rows:
        return rows
    tile_rows = max_rows
    # v7x has 2 TensorCores per chip: prefer an even number of tiles so the
    # "parallel" grid axis splits into balanced halves (no straggler tile).
    if "v7" in kind:
        n_tiles = pl.cdiv(rows, tile_rows)
        if n_tiles > 1 and n_tiles % 2 == 1:
            cand = pl.cdiv(rows, n_tiles + 1)
            cand = max(sublane, pl.cdiv(cand, sublane) * sublane)
            if pl.cdiv(rows, cand) % 2 == 0:
                tile_rows = cand
    return tile_rows


def _multiply_slab(x2d: jax.Array, b_arg: jax.Array, kind: str) -> jax.Array:
    rows, lane = x2d.shape
    dtype = x2d.dtype
    itemsize = jnp.dtype(dtype).itemsize
    sublane = _SUBLANE.get(itemsize, 8)
    tile_rows = _choose_tile_rows(rows, lane, itemsize, sublane, kind)

    if tile_rows >= rows:
        # Single tile: skip the grid / software pipeline entirely.
        return pl.pallas_call(
            _multiply_kernel,
            out_shape=jax.ShapeDtypeStruct((rows, lane), dtype),
            in_specs=[
                pl.BlockSpec(memory_space=pltpu.SMEM),   # scalar parameter b
                pl.BlockSpec(memory_space=pltpu.VMEM),   # whole x slab
            ],
            out_specs=pl.BlockSpec(memory_space=pltpu.VMEM),
        )(b_arg, x2d)

    grid = (pl.cdiv(rows, tile_rows),)
    # PARALLEL is a no-op on single-TC chips (v5e/v6e) and lets the runtime
    # shard the row axis across v7x's two TensorCores.
    # TODO(synk): if PARALLEL does not shard across TCs on a given v7x
    # toolchain, switch this axis to pltpu.CORE_PARALLEL for that chip only.
    return pl.pallas_call(
        _multiply_kernel,
        out_shape=jax.ShapeDtypeStruct((rows, lane), dtype),
        grid=grid,
        in_specs=[
            pl.BlockSpec(memory_space=pltpu.SMEM),              # scalar b
            pl.BlockSpec((tile_rows, lane), lambda i: (i, 0)),  # x tiles
        ],
        out_specs=pl.BlockSpec((tile_rows, lane), lambda i: (i, 0)),
        compiler_params=pltpu.CompilerParams(
            dimension_semantics=(pltpu.PARALLEL,)),
    )(b_arg, x2d)


def multiply_model(x: jax.Array, b: jax.Array) -> jax.Array:
    """Computes b * x where b is a scalar parameter of shape (1,)."""
    assert b.shape == (1,)
    orig_shape = x.shape
    dtype = x.dtype
    n_elems = x.size
    itemsize = jnp.dtype(dtype).itemsize
    sublane = _SUBLANE.get(itemsize, 8)
    kind = _chip_kind()

    # SMEM holds 32-bit scalars: cast b to x.dtype when x is 32-bit wide,
    # otherwise keep it f32 and let the kernel cast the product to o_ref.dtype.
    b_arg = b.astype(dtype) if itemsize >= 4 else b.astype(jnp.float32)

    lane, rows = _choose_layout(n_elems, sublane)
    if lane is not None:
        x2d = jnp.ravel(x).reshape(rows, lane)
        return _multiply_slab(x2d, b_arg, kind).reshape(orig_shape)

    # x.size is not a multiple of 128: run the kernel on the 128-aligned
    # prefix and handle the <128-element tail in plain JAX (no full-array
    # pad / slice passes over x).
    x_flat = jnp.ravel(x)
    main_n = (n_elems // 128) * 128
    if main_n == 0:
        # TODO(synk): sub-128-element inputs are computed in plain JAX; a
        # kernel launch would be pure overhead at this size.
        return (b_arg[0] * x_flat).astype(dtype).reshape(orig_shape)
    lane, rows = _choose_layout(main_n, sublane)
    main = _multiply_slab(x_flat[:main_n].reshape(rows, lane), b_arg, kind)
    tail = (b_arg[0] * x_flat[main_n:]).astype(dtype)
    return jnp.concatenate([main.reshape(-1), tail]).reshape(orig_shape)


if __name__ == "__main__":
    key = jax.random.PRNGKey(0)
    kx, kb = jax.random.split(key)

    # Small NCHW input consistent with the module's forward.
    x = jax.random.normal(kx, (2, 4, 16, 16), dtype=jnp.float32)
    # Deterministic parameter init, matching nn.Parameter(torch.randn(1)).
    b = jax.random.normal(kb, (1,), dtype=jnp.float32)

    y = jax.block_until_ready(multiply_model(x, b))

    # Reference check against plain JAX broadcasting (same as torch's b * x).
    y_ref = b * x
    assert y.shape == x.shape and y.dtype == x.dtype
    assert jnp.allclose(y, y_ref, atol=1e-6, rtol=1e-6)

    print("KERNEL_OK")
</pallas_src>

<mosaic_0001>
module attributes {stable_mosaic.version = 11 : i64} {
  func.func @_multiply_kernel(%arg0: memref<1xf32, #tpu.memory_space<smem>>, %arg1: memref<8x256xf32, #tpu.memory_space<vmem>>, %arg2: memref<8x256xf32, #tpu.memory_space<vmem>>) attributes {dimension_semantics = [], scalar_prefetch = 0 : i64, scratch_operands = 0 : i64, tpu.core_type = #tpu.core_type<tc>} {
    %c0 = arith.constant 0 : index
    %0 = memref.load %arg0[%c0] : memref<1xf32, #tpu.memory_space<smem>>
    %c0_0 = arith.constant 0 : index
    %c0_1 = arith.constant 0 : index
    %1 = vector.load %arg1[%c0_0, %c0_1] : memref<8x256xf32, #tpu.memory_space<vmem>>, vector<8x256xf32>
    %2 = vector.broadcast %0 : f32 to vector<8x256xf32>
    %3 = arith.mulf %2, %1 : vector<8x256xf32>
    %c0_2 = arith.constant 0 : index
    %c0_3 = arith.constant 0 : index
    %4 = vector.load %arg2[%c0_2, %c0_3] : memref<8x256xf32, #tpu.memory_space<vmem>>, vector<8x256xf32>
    tpu.vector_store %arg2[%c0_2, %c0_3], %3 {strides = array<i32>} : memref<8x256xf32, #tpu.memory_space<vmem>>, vector<8x256xf32>,
    return
  }
}

</mosaic_0001>

<bundles_post_ra>
// kernel: tpu_custom_call.1
= control target key start
LH: loop header
LB: loop body
LE: loop exit
PB: predicated region body
PF: predicated region fallthrough
CT: control target
= control target key end

     0   :  { %8 = vsyncpa [#allocation4], 0  ;;  %s132_s0 = inlined_call_operand.<no memory space> [shape: f32[1], index: 0, kind: input, shape index: {}]   ;;  %s133_s1 = inlined_call_operand.hbm [shape: f32[8,256], index: 1, kind: input, shape index: {}]   ;;  %s134_s2 = inlined_call_operand.hbm [shape: f32[8,256], index: 2, kind: output, shape index: {}]  }
   0x1   :  { %9 = vsyncpa [#allocation5], 0  ;;  %s17_s11 = sshll.u32 %s133_s1, 4  ;;  %s106_s12 = smov [#allocation3]   ;;  %s18_s11 = int_to_ptr.hbm [resolvable:$true] %s17_s11 }
   0x2   :  { %s19_s13 = sshll.u32 %s106_s12, 4  ;;  %s20_s13 = int_to_ptr.vmem [resolvable:$true] %s19_s13 }
   0x3   :  { %22 = dma.hbm_to_vmem [thread:$0]  %s18_s11, 256, %s20_s13, [#allocation4]  }
   0x4   :  { %102 = dma.done.wait [#allocation4], 256  }
   0x5   :  { %103 = vsyncadd [#allocation4], 4294967040  ;;  %v30_v0 = vstv %s132_s0  ;;  %s107_s16 = smov [#allocation6]   ;;  %s42_s20 = sshll.u32 %s134_s2, 4  ;;  %v28_v1 = vld [vmem:[#allocation3] sm:$0xff]  ;;  %v29_v2 = vld [vmem:[#allocation3 + $0x8] sm:$0xff]  ;;  %s43_s20 = int_to_ptr.hbm [resolvable:$true] %s42_s20 }
   0x6   :  { %s40_s17 = sshll.u32 %s107_s16, 4  ;;  %v31_v3 = vmul.f32 %v30_v0, %v28_v1  ;;  %v32_v4 = vmul.f32 %v30_v0, %v29_v2  ;;  %s41_s17 = int_to_ptr.vmem [resolvable:$true] %s40_s17 }
   0x8   :  { %33 = vst [vmem:[#allocation6] sm:$0xff] %v31_v3 }
   0x9   :  { %34 = vst [vmem:[#allocation6 + $0x8] sm:$0xff] %v32_v4 }
   0xa   :  { %45 = dma.vmem_to_hbm [thread:$0]  %s41_s17, 256, %s43_s20, [#allocation5]  }
   0xb   :  { %104 = dma.done.wait [#allocation5], 256  }
   0xc   :  { %105 = vsyncadd [#allocation5], 4294967040 }
   0xd   :  { %50 = vsyncpa [#allocation4], 1 }
   0xe   :  { %51 = vsyncpa [#allocation5], 1 }

</bundles_post_ra>
